<compile_context>
chip_gen: v5e
topology: v5e:2x2
jax: 0.10.0
libtpu: 0.0.40
codegen_flags: <defaults>
</compile_context>

<pallas_src>
import math
from functools import partial

import jax
import jax.numpy as jnp
from jax.experimental import pallas as pl
from jax.experimental.pallas import tpu as pltpu


def _round_up(x: int, m: int) -> int:
    return (x + m - 1) // m * m


def _time_embedding_kernel(freqs_ref, phase_ref, t_ref, out_ref, *,
                           embed_dim: int, k: int):
    """One lane-dense tile of the packed sinusoidal embedding.

    freqs_ref: (1, k*embed_dim)   resident table: [freqs, freqs] tiled k times
    phase_ref: (1, k*embed_dim)   resident table: [0.., pi/2..] tiled k times
    t_ref:     (block_rows, k)    k timesteps packed per output row
    out_ref:   (block_rows, k*embed_dim)  lane-dense output slab
    """
    t = t_ref[...]                                      # (bs, k) f32
    bs = t.shape[0]
    if k == 1:
        t_slab = jnp.broadcast_to(t, (bs, embed_dim))   # lane broadcast
    else:
        # Block-repeat each packed timestep across its embed_dim columns:
        # k cheap lane-broadcasts + one in-register concat (no VMEM stores).
        pieces = [jnp.broadcast_to(t[:, j:j + 1], (bs, embed_dim))
                  for j in range(k)]
        t_slab = jnp.concatenate(pieces, axis=-1)       # (bs, k*embed_dim)

    # cos(x) == sin(x + pi/2): one transcendental stream over the whole slab,
    # then one unmasked, full-vreg-width store.  Phase add stays in f32.
    emb = t_slab * freqs_ref[...] + phase_ref[...]
    out_ref[...] = jnp.sin(emb).astype(out_ref.dtype)


def _pick_target_tile_bytes() -> int:
    """Generation-aware output tile size (bytes)."""
    try:
        kind = jax.devices()[0].device_kind.lower()
    except Exception:  # pragma: no cover - defensive fallback
        kind = ""
    if "v5" in kind:        # v5e: 16 MiB default scoped VMEM, 0.82 TB/s HBM
        return 4 << 20
    return 8 << 20          # v6e / v7x: bigger tiles amortize per-step overhead


def time_embedding(t: jax.Array, embed_dim: int,
                   out_dtype=jnp.float32) -> jax.Array:
    """Pallas TPU equivalent of TimeEmbedding(embed_dim)(t).  t: (B,) float."""
    assert embed_dim % 2 == 0 and embed_dim >= 4, (
        "embed_dim must be even and >= 4 (embed_dim == 2 divides by zero in "
        "the reference formula)")
    half_dim = embed_dim // 2
    scale = math.log(10000.0) / (half_dim - 1)

    t = jnp.asarray(t)
    if t.ndim == 2 and t.shape[-1] == 1:
        t = t[:, 0]
    if t.ndim != 1:
        raise ValueError(f"t must have shape (B,) or (B, 1), got {t.shape}")
    b = t.shape[0]

    # Pack k timesteps per output row so the output last dim is lane-dense
    # (multiple of 128).  k == 1 when embed_dim is already a multiple of 128.
    k = 128 // math.gcd(embed_dim, 128)
    cols = k * embed_dim

    # Resident tables (computed once in the wrapper, reused by every tile).
    freqs = jnp.exp(jnp.arange(half_dim, dtype=jnp.float32) * (-scale))
    freqs_pattern = jnp.concatenate([freqs, freqs])                 # (embed_dim,)
    phase_pattern = jnp.concatenate([
        jnp.zeros((half_dim,), jnp.float32),
        jnp.full((half_dim,), math.pi / 2, dtype=jnp.float32),
    ])
    freqs_slab = jnp.tile(freqs_pattern, k).reshape(1, cols)
    phase_slab = jnp.tile(phase_pattern, k).reshape(1, cols)

    # Row tiling: even split across tiles (pad <= ~8 rows per tile), and at
    # least 2 grid steps when possible so both v7x TensorCores are used.
    rows = _round_up(pl.cdiv(b, k), 8)
    target_tile_bytes = _pick_target_tile_bytes()
    max_block_rows = max(8, (target_tile_bytes // (cols * 4)) // 8 * 8)
    num_tiles = pl.cdiv(rows, max_block_rows)
    if rows >= 16 and num_tiles < 2:
        num_tiles = 2
    block_rows = min(rows, _round_up(pl.cdiv(rows, num_tiles), 8))
    num_tiles = pl.cdiv(rows, block_rows)
    rows_padded = num_tiles * block_rows
    b_padded = rows_padded * k

    t_flat = t.astype(jnp.float32).reshape(b)
    if b_padded != b:
        t_flat = jnp.pad(t_flat, (0, b_padded - b))
    t2d = t_flat.reshape(rows_padded, k)

    kernel = partial(_time_embedding_kernel, embed_dim=embed_dim, k=k)

    out = pl.pallas_call(
        kernel,
        out_shape=jax.ShapeDtypeStruct((rows_padded, cols), out_dtype),
        grid=(num_tiles,),
        in_specs=[
            pl.BlockSpec((1, cols), lambda i: (0, 0)),          # freqs: resident
            pl.BlockSpec((1, cols), lambda i: (0, 0)),          # phase: resident
            pl.BlockSpec((block_rows, k), lambda i: (i, 0)),    # timesteps
        ],
        out_specs=pl.BlockSpec((block_rows, cols), lambda i: (i, 0)),
        compiler_params=pltpu.CompilerParams(
            dimension_semantics=("parallel",),
            vmem_limit_bytes=48 * 1024 * 1024,
        ),
    )(freqs_slab, phase_slab, t2d)

    # Free row-major re-view back to (B, embed_dim); drop padded rows.
    return out.reshape(rows_padded * k, embed_dim)[:b]


def _reference(t, embed_dim):
    half_dim = embed_dim // 2
    scale = math.log(10000.0) / (half_dim - 1)
    freqs = jnp.exp(jnp.arange(half_dim, dtype=jnp.float32) * -scale)
    emb = t[:, None].astype(jnp.float32) * freqs[None, :]
    return jnp.concatenate([jnp.sin(emb), jnp.cos(emb)], axis=-1)


if __name__ == "__main__":
    # Main config: diffusion-style timesteps, embed_dim (32) smaller than a lane.
    batch, embed_dim = 8, 32
    t = jax.random.uniform(jax.random.PRNGKey(0), (batch,), dtype=jnp.float32,
                           minval=0.0, maxval=1000.0)
    out = jax.block_until_ready(time_embedding(t, embed_dim))
    ref = _reference(t, embed_dim)
    assert out.shape == (batch, embed_dim)
    # cos(x) is computed as sin(x + pi/2); for t ~ 1e3 the f32 phase add can
    # perturb the argument by ~6e-5, hence atol=2e-4.
    assert jnp.allclose(out, ref, atol=2e-4, rtol=1e-5), "mismatch (embed_dim=32)"

    # Second config: lane-aligned embed_dim and a batch that is not a multiple
    # of 8 (exercises k == 1 path and row padding).
    batch2, embed_dim2 = 5, 128
    t2 = jax.random.uniform(jax.random.PRNGKey(1), (batch2,), dtype=jnp.float32,
                            minval=0.0, maxval=1000.0)
    out2 = jax.block_until_ready(time_embedding(t2, embed_dim2))
    ref2 = _reference(t2, embed_dim2)
    assert out2.shape == (batch2, embed_dim2)
    assert jnp.allclose(out2, ref2, atol=2e-4, rtol=1e-5), "mismatch (embed_dim=128)"

    print("KERNEL_OK")
</pallas_src>

<mosaic_0001>
module attributes {stable_mosaic.version = 11 : i64} {
  func.func @_time_embedding_kernel(%arg0: i32, %arg1: memref<1x128xf32, #tpu.memory_space<vmem>>, %arg2: memref<1x128xf32, #tpu.memory_space<vmem>>, %arg3: memref<8x4xf32, #tpu.memory_space<vmem>>, %arg4: memref<8x128xf32, #tpu.memory_space<vmem>>) attributes {dimension_semantics = [#tpu.dimension_semantics<parallel>], iteration_bounds = array<i64: 1>, scalar_prefetch = 0 : i64, scratch_operands = 0 : i64, tpu.core_type = #tpu.core_type<tc>, window_params = [{pipeline_mode = #tpu.pipeline_mode<synchronous>, transform_indices = @transform_0, window_bounds = array<i64: 1, 128>}, {pipeline_mode = #tpu.pipeline_mode<synchronous>, transform_indices = @transform_1, window_bounds = array<i64: 1, 128>}, {transform_indices = @transform_2, window_bounds = array<i64: 8, 4>}, {transform_indices = @transform_3, window_bounds = array<i64: 8, 128>}]} {
    %c0 = arith.constant 0 : index
    %c0_0 = arith.constant 0 : index
    %0 = vector.load %arg3[%c0, %c0_0] : memref<8x4xf32, #tpu.memory_space<vmem>>, vector<8x4xf32>
    %1 = vector.extract_strided_slice %0 {offsets = [0, 0], sizes = [8, 1], strides = [1, 1]} : vector<8x4xf32> to vector<8x1xf32>
    %2 = vector.shape_cast %1 : vector<8x1xf32> to vector<8x1xf32>
    %3 = vector.broadcast %2 : vector<8x1xf32> to vector<8x32xf32>
    %4 = vector.extract_strided_slice %0 {offsets = [0, 1], sizes = [8, 1], strides = [1, 1]} : vector<8x4xf32> to vector<8x1xf32>
    %5 = vector.shape_cast %4 : vector<8x1xf32> to vector<8x1xf32>
    %6 = vector.broadcast %5 : vector<8x1xf32> to vector<8x32xf32>
    %7 = vector.extract_strided_slice %0 {offsets = [0, 2], sizes = [8, 1], strides = [1, 1]} : vector<8x4xf32> to vector<8x1xf32>
    %8 = vector.shape_cast %7 : vector<8x1xf32> to vector<8x1xf32>
    %9 = vector.broadcast %8 : vector<8x1xf32> to vector<8x32xf32>
    %10 = vector.extract_strided_slice %0 {offsets = [0, 3], sizes = [8, 1], strides = [1, 1]} : vector<8x4xf32> to vector<8x1xf32>
    %11 = vector.shape_cast %10 : vector<8x1xf32> to vector<8x1xf32>
    %12 = vector.broadcast %11 : vector<8x1xf32> to vector<8x32xf32>
    %13 = tpu.concatenate %3, %6, %9, %12 in 1 : vector<8x32xf32>, vector<8x32xf32>, vector<8x32xf32>, vector<8x32xf32> -> vector<8x128xf32>
    %c0_1 = arith.constant 0 : index
    %c0_2 = arith.constant 0 : index
    %14 = vector.load %arg1[%c0_1, %c0_2] : memref<1x128xf32, #tpu.memory_space<vmem>>, vector<1x128xf32>
    %15 = vector.broadcast %14 : vector<1x128xf32> to vector<8x128xf32>
    %16 = arith.mulf %13, %15 : vector<8x128xf32>
    %c0_3 = arith.constant 0 : index
    %c0_4 = arith.constant 0 : index
    %17 = vector.load %arg2[%c0_3, %c0_4] : memref<1x128xf32, #tpu.memory_space<vmem>>, vector<1x128xf32>
    %18 = vector.broadcast %17 : vector<1x128xf32> to vector<8x128xf32>
    %19 = arith.addf %16, %18 : vector<8x128xf32>
    %20 = math.sin %19 : vector<8x128xf32>
    %c0_5 = arith.constant 0 : index
    %c0_6 = arith.constant 0 : index
    %21 = vector.load %arg4[%c0_5, %c0_6] : memref<8x128xf32, #tpu.memory_space<vmem>>, vector<8x128xf32>
    tpu.vector_store %arg4[%c0_5, %c0_6], %20 {strides = array<i32>} : memref<8x128xf32, #tpu.memory_space<vmem>>, vector<8x128xf32>,
    return
  }
  func.func @transform_0(%arg0: i32) -> (i32, i32) {
    %c0_i32 = arith.constant 0 : i32
    %c0_i32_0 = arith.constant 0 : i32
    %c0_i32_1 = arith.constant 0 : i32
    return %c0_i32, %c0_i32_0 : i32, i32
  }
  func.func @transform_1(%arg0: i32) -> (i32, i32) {
    %c0_i32 = arith.constant 0 : i32
    %c0_i32_0 = arith.constant 0 : i32
    %c0_i32_1 = arith.constant 0 : i32
    return %c0_i32, %c0_i32_0 : i32, i32
  }
  func.func @transform_2(%arg0: i32) -> (i32, i32) {
    %c0_i32 = arith.constant 0 : i32
    %c0_i32_0 = arith.constant 0 : i32
    return %arg0, %c0_i32 : i32, i32
  }
  func.func @transform_3(%arg0: i32) -> (i32, i32) {
    %c0_i32 = arith.constant 0 : i32
    %c0_i32_0 = arith.constant 0 : i32
    return %arg0, %c0_i32 : i32, i32
  }
}

</mosaic_0001>

<bundles_post_ra>
// kernel: tpu_custom_call.1
= control target key start
LH: loop header
LB: loop body
LE: loop exit
PB: predicated region body
PF: predicated region fallthrough
CT: control target
= control target key end

     0   :  { %v268_v1 = vmov 0   ;;  %v269_v2 = vmov 2   ;;  %s370_s0 = inlined_call_operand.vmem [shape: f32[1,128], index: 0, kind: input, shape index: {}]   ;;  %s371_s1 = inlined_call_operand.vmem [shape: f32[1,128], index: 1, kind: input, shape index: {}]   ;;  %s372_s2 = inlined_call_operand.vmem [shape: f32[8,4], index: 2, kind: input, shape index: {}]   ;;  %s373_s3 = inlined_call_operand.hbm [shape: f32[8,128], index: 3, kind: output, shape index: {}]  }
   0x1   :  { %v15_v0 = vld [vmem:[%s372_s2] sm:$0xff]  ;;  %235 = vset.pattern.permute.xlu0 %v268_v1  ;;  %237 = vset.pattern.permute.xlu1 %v269_v2 }
   0x2   :  { %8 = vsyncpa [#allocation3], 0  ;;  %18 = vperm.xlu0 %235, %v15_v0   ;;  %26 = vperm.xlu1 %237, %v15_v0   ;;  %v270_v3 = vmov 1   ;;  %v271_v4 = vmov 3   ;;  %vm33_vm0 = vcmask 261120   ;;  %vm35_vm1 = vcmask 523264  }
   0x3   :  { %vm37_vm2 = vcmask 785408   ;;  %v240_v8 = vld [vmem:[%s370_s0] ss:$0 sm:$0xff]  ;;  %v272_v27 = vmov 2102212464   ;;  %s278_s0 = smov [#allocation2]  }
   0x4   :  { %v241_v11 = vld [vmem:[%s371_s1] ss:$0 sm:$0xff]  ;;  %v273_v29 = vmov 920167782   ;;  %v274_v32 = vmov 1326507024  }
   0x5   :  { %v275_v34 = vmov 683565275   ;;  %v276_v36 = vmov 2475754826   ;;  %v277_v39 = vmov 2131351028  }
   0x6   :  { %s210_s1 = sshll.u32 %s278_s0, 4  ;;  %s212_s19 = sshll.u32 %s373_s3, 4  ;;  %s211_s1 = int_to_ptr.vmem [resolvable:$true] %s210_s1  ;;  %s213_s19 = int_to_ptr.hbm [resolvable:$true] %s212_s19 }
   0xa   :  { %236 = vset.pattern.permute.xlu0 %v270_v3  ;;  %238 = vset.pattern.permute.xlu1 %v271_v4 }
   0xb   :  { %22 = vperm.xlu0 %236, %v15_v0   ;;  %30 = vperm.xlu1 %238, %v15_v0  }
  0x13   :  { %239 = vset.pattern.permute.xlu0 %v271_v4 }
  0x74   :  { %v19_v5 = vpop.permute.xlu0 %18  ;;  %v27_v6 = vpop.permute.xlu1 %26 }
  0x7d   :  { %v23_v7 = vpop.permute.xlu0 %22  ;;  %v31_v9 = vpop.permute.xlu1 %30 }
  0x7e   :  { %v34_v10 = vsel %vm33_vm0, %v19_v5, %v23_v7 }
  0x7f   :  { %v36_v12 = vsel %vm35_vm1, %v34_v10, %v27_v6 }
  0x80   :  { %v38_v13 = vsel %vm37_vm2, %v36_v12, %v31_v9 }
  0x81   :  { %v43_v14 = vmul.f32 %v240_v8, %v38_v13 }
  0x83   :  { %v309_v15 = vadd.f32 %v241_v11, %v43_v14 }
  0x85   :  { %v52_v16 = vand.u32 2139095040, %v309_v15  ;;  %v49_v19 = vand.u32 2147483647, %v309_v15  ;;  %vm51_vm15 = vcmp.lt.s32.totalorder %v309_v15, 0 }
  0x87   :  { %v53_v17 = vshrl.u32 %v52_v16, 23  ;;  %v56_v21 = vand.u32 8388607, %v49_v19  ;;  %vm50_vm0 = vcmp.le.f32.partialorder %v49_v19, 0.7853982 }
  0x89   :  { %v221_v18 = vadd.s32 4294967169, %v53_v17  ;;  %v57_v25 = vor.u32 8388608, %v56_v21 }
  0x8b   :  { %v59_v20 = vadd.s32 1, %v221_v18  ;;  %v324_v46 = vshll.u32 %v57_v25, 8 }
  0x8d   :  { %vm60_vm3 = vcmp.gt.s32.totalorder %v59_v20, 0  ;;  %v98_v56 = vand.u32 65535, %v324_v46  ;;  %v99_v58 = vshrl.u32 %v324_v46, 16 }
  0x8e   :  { %v61_v22 = vsel %vm60_vm3, %v59_v20, 0 }
  0x8f   :  { %v63_v23 = vand.u32 31, %v61_v22  ;;  %v317_v26 = vshrl.u32 %v61_v22, 5 }
  0x91   :  { %v315_v24 = vsub.s32 32, %v63_v23  ;;  %v75_v28 = vshll.u32 %v272_v27, %v63_v23  ;;  %v78_v30 = vshll.u32 %v273_v29, %v63_v23  ;;  %v66_v35 = vshll.u32 %v275_v34, %v63_v23 }
  0x92   :  { %v69_v38 = vshll.u32 %v276_v36, %v63_v23  ;;  %v72_v41 = vshll.u32 %v277_v39, %v63_v23  ;;  %vm84_vm4 = vcmp.lt.s32.totalorder %v317_v26, 4  ;;  %vm81_vm5 = vcmp.lt.s32.totalorder %v317_v26, 1 }
  0x93   :  { %v76_v31 = vshrl.u32 %v273_v29, %v315_v24  ;;  %v79_v33 = vshrl.u32 %v274_v32, %v315_v24  ;;  %v67_v37 = vshrl.u32 %v276_v36, %v315_v24  ;;  %v70_v40 = vshrl.u32 %v277_v39, %v315_v24 }
  0x94   :  { %v73_v42 = vshrl.u32 %v272_v27, %v315_v24  ;;  %vm83_vm6 = vcmp.lt.s32.totalorder %v317_v26, 3  ;;  %vm82_vm7 = vcmp.lt.s32.totalorder %v317_v26, 2  ;;  %v65_v20 = vshrl.u32 %v275_v34, %v315_v24 }
  0x95   :  { %v77_v43 = vor.u32 %v76_v31, %v75_v28  ;;  %v80_v44 = vor.u32 %v79_v33, %v78_v30  ;;  %v68_v45 = vor.u32 %v67_v37, %v66_v35  ;;  %v71_v47 = vor.u32 %v70_v40, %v69_v38 }
  0x96   :  { %v74_v48 = vor.u32 %v73_v42, %v72_v41 }
  0x97   :  { %v90_v49 = vsel %vm84_vm4, %v77_v43, 920167782  ;;  %v94_v50 = vsel %vm84_vm4, %v80_v44, 1326507024  ;;  %v89_v51 = vsel %vm81_vm5, %v68_v45, %v71_v47  ;;  %v85_v28 = vsel %vm81_vm5, %v65_v20, %v68_v45 }
  0x98   :  { %v91_v52 = vsel %vm83_vm6, %v74_v48, %v90_v49  ;;  %v93_v53 = vsel %vm81_vm5, %v71_v47, %v74_v48  ;;  %v95_v55 = vsel %vm83_vm6, %v77_v43, %v94_v50  ;;  %v86_v16 = vsel %vm84_vm4, %v74_v48, 2102212464 }
  0x99   :  { %v92_v54 = vsel %vm82_vm7, %v89_v51, %v91_v52  ;;  %v96_v57 = vsel %vm82_vm7, %v93_v53, %v95_v55  ;;  %v87_v29 = vsel %vm83_vm6, %v71_v47, %v86_v16  ;;  %vm192_vm4 = vweird.f32 %v309_v15 }
  0x9a   :  { %v122_v59 = vand.u32 65535, %v92_v54  ;;  %v123_v60 = vshrl.u32 %v92_v54, 16  ;;  %v100_v61 = vand.u32 65535, %v96_v57  ;;  %v101_v62 = vshrl.u32 %v96_v57, 16 }
  0x9b   :  { %v88_v34 = vsel %vm82_vm7, %v85_v28, %v87_v29 }
  0x9c   :  { %v125_v63 = vmul.u32 %v123_v60, %v98_v56  ;;  %v126_v0 = vmul.u32 %v122_v59, %v99_v58  ;;  %v103_v2 = vmul.u32 %v101_v62, %v98_v56  ;;  %v104_v3 = vmul.u32 %v100_v61, %v99_v58 }
  0x9d   :  { %v124_v4 = vmul.u32 %v122_v59, %v98_v56  ;;  %v102_v6 = vmul.u32 %v100_v61, %v98_v56  ;;  %v127_v8 = vmul.u32 %v123_v60, %v99_v58  ;;  %v105_v9 = vmul.u32 %v101_v62, %v99_v58 }
  0x9e   :  { %v128_v5 = vshll.u32 %v125_v63, 16  ;;  %v106_v7 = vshll.u32 %v103_v2, 16  ;;  %v130_v10 = vshll.u32 %v126_v0, 16  ;;  %v108_v12 = vshll.u32 %v104_v3, 16 }
  0x9f   :  { %v129_v25 = vshrl.u32 %v125_v63, 16  ;;  %v107_v30 = vshrl.u32 %v103_v2, 16  ;;  %v131_v32 = vshrl.u32 %v126_v0, 16  ;;  %v109_v35 = vshrl.u32 %v104_v3, 16 }
  0xa0   :  { %vm132_vm8 = vc.u32 %v124_v4, %v128_v5  ;;  %v134_v11 = vadd.s32 %v128_v5, %v124_v4  ;;  %vm110_vm9 = vc.u32 %v102_v6, %v106_v7  ;;  %v112_v13 = vadd.s32 %v106_v7, %v102_v6 }
  0xa1   :  { %v133_v14 = vsel %vm132_vm8, 1, %v268_v1  ;;  %v111_v17 = vsel %vm110_vm9, 1, %v268_v1  ;;  %v142_v39 = vmul.u32 %v324_v46, %v88_v34 }
  0xa2   :  { %v135_v18 = vadd.s32 %v133_v14, %v127_v8  ;;  %vm136_vm10 = vc.u32 %v134_v11, %v130_v10  ;;  %v113_v21 = vadd.s32 %v111_v17, %v105_v9  ;;  %vm114_vm11 = vc.u32 %v112_v13, %v108_v12 }
  0xa3   :  { %v137_v22 = vsel %vm136_vm10, 1, %v268_v1  ;;  %v115_v23 = vsel %vm114_vm11, 1, %v268_v1  ;;  %v138_v1 = vadd.s32 %v134_v11, %v130_v10 }
  0xa4   :  { %v139_v27 = vadd.s32 %v137_v22, %v135_v18  ;;  %v117_v31 = vadd.s32 %v115_v23, %v113_v21 }
  0xa6   :  { %v140_v33 = vadd.s32 %v139_v27, %v129_v25  ;;  %v118_v24 = vadd.s32 %v117_v31, %v107_v30 }
  0xa8   :  { %v141_v36 = vadd.s32 %v140_v33, %v131_v32  ;;  %v119_v37 = vadd.s32 %v118_v24, %v109_v35 }
  0xaa   :  { %v145_v38 = vadd.s32 1, %v141_v36  ;;  %vm144_vm12 = vc.u32 %v119_v37, %v138_v1  ;;  %v143_v51 = vadd.s32 %v138_v1, %v119_v37 }
  0xac   :  { %v146_v40 = vsel %vm144_vm12, %v145_v38, %v141_v36 }
  0xad   :  { %v147_v41 = vadd.s32 %v146_v40, %v142_v39 }
  0xaf   :  { %v148_v42 = vadd.s32 536870912, %v147_v41 }
  0xb1   :  { %v149_v43 = vshrl.u32 %v148_v42, 30 }
  0xb3   :  { %v150_v44 = vshll.u32 %v149_v43, 30  ;;  %v173_v0 = vsub.s32 4, %v149_v43 }
  0xb5   :  { %v151_v45 = vsub.s32 %v147_v41, %v150_v44  ;;  %v174_v6 = vsel %vm51_vm15, %v173_v0, %v149_v43 }
  0xb6   :  { %v176_v9 = vsel %vm50_vm0, 0, %v174_v6 }
  0xb7   :  { %vm152_vm13 = vcmp.lt.s32.totalorder %v151_v45, 0  ;;  %v153_v47 = vsub.s32 0, %v151_v45  ;;  %v193_v14 = vadd.s32 3, %v176_v9 }
  0xb9   :  { %v154_v48 = vsel %vm152_vm13, %v153_v47, %v151_v45  ;;  %v194_v20 = vand.u32 3, %v193_v14 }
  0xba   :  { %v155_v49 = vclz %v154_v48 }
  0xbb   :  { %vm196_vm1 = vcmp.eq.s32.totalorder %v194_v20, 0  ;;  %vm199_vm2 = vcmp.eq.s32.totalorder %v194_v20, 2  ;;  %vm195_vm3 = vcmp.lt.s32.totalorder %v194_v20, 2 }
  0xbc   :  { %v222_v50 = vadd.s32 4294967294, %v155_v49 }
  0xbe   :  { %vm223_vm14 = vcmp.lt.s32.totalorder %v222_v50, 0 }
  0xbf   :  { %v158_v26 = vsel %vm223_vm14, 0, %v222_v50 }
  0xc0   :  { %v159_v52 = vsub.s32 32, %v158_v26  ;;  %v163_v53 = vsub.s32 4294967266, %v158_v26  ;;  %v160_v54 = vshll.u32 %v151_v45, %v158_v26 }
  0xc2   :  { %v161_v55 = vshrl.u32 %v143_v51, %v159_v52  ;;  %v164_v46 = vadd.s32 127, %v163_v53 }
  0xc4   :  { %v162_v56 = vor.u32 %v161_v55, %v160_v54  ;;  %v165_v57 = vshll.u32 %v164_v46, 23 }
  0xc6   :  { %v166_v58 = vor.u32 4788187, %v165_v57  ;;  %v169_v60 = vcvt.s32.f32 %v162_v56 }
  0xc8   :  { %v167_v59 = vand.u32 2147483647, %v166_v58 }
  0xca   :  { %v170_v61 = vmul.f32 %v169_v60, %v167_v59 }
  0xcc   :  { %v171_v62 = vxor.u32 2147483648, %v170_v61 }
  0xce   :  { %v172_v63 = vsel %vm51_vm15, %v171_v62, %v170_v61 }
  0xcf   :  { %v175_v2 = vsel %vm50_vm0, %v309_v15, %v172_v63 }
  0xd0   :  { %v177_v3 = vmul.f32 %v175_v2, %v175_v2 }
  0xd2   :  { %v178_v4 = vmul.f32 -0.001358992, %v177_v3  ;;  %v185_v5 = vmul.f32 -0.00019511016, %v177_v3 }
  0xd4   :  { %v179_v7 = vadd.f32 0.041655596, %v178_v4  ;;  %v186_v8 = vadd.f32 0.008332121, %v185_v5 }
  0xd6   :  { %v180_v10 = vmul.f32 %v179_v7, %v177_v3  ;;  %v187_v11 = vmul.f32 %v186_v8, %v177_v3 }
  0xd8   :  { %v181_v12 = vadd.f32 -0.4999988, %v180_v10  ;;  %v188_v13 = vadd.f32 -0.16666654, %v187_v11 }
  0xda   :  { %v182_v16 = vmul.f32 %v181_v12, %v177_v3  ;;  %v189_v17 = vmul.f32 %v188_v13, %v177_v3 }
  0xdc   :  { %v183_v18 = vadd.f32 1.0, %v182_v16  ;;  %v190_v19 = vadd.f32 1.0, %v189_v17 }
  0xde   :  { %v191_v21 = vmul.f32 %v190_v19, %v175_v2  ;;  %v200_v22 = vxor.u32 2147483648, %v183_v18 }
  0xe0   :  { %v197_v23 = vxor.u32 2147483648, %v191_v21  ;;  %v201_v27 = vsel %vm199_vm2, %v200_v22, %v191_v21 }
  0xe2   :  { %v198_v25 = vsel %vm196_vm1, %v183_v18, %v197_v23 }
  0xe3   :  { %v202_v28 = vsel %vm195_vm3, %v198_v25, %v201_v27 }
  0xe4   :  { %v203_v29 = vsel %vm192_vm4, nan, %v202_v28 }
  0xe5   :  { %204 = vst [vmem:[#allocation2] sm:$0xff] %v203_v29 }
  0xe6   :  { %215 = dma.vmem_to_hbm [thread:$0]  %s211_s1, 128, %s213_s19, [#allocation3]  }
  0xe7   :  { %266 = dma.done.wait [#allocation3], 128  }
  0xe8   :  { %267 = vsyncadd [#allocation3], 4294967168 }
  0xe9   :  { %220 = vsyncpa [#allocation3], 1 }

</bundles_post_ra>
